<compile_context>
chip_gen: v5e
topology: v5e:2x2
jax: 0.10.0
libtpu: 0.0.40
codegen_flags: <defaults>
</compile_context>

<pallas_src>
import jax
import jax.numpy as jnp
from jax.experimental import pallas as pl
from jax.experimental.pallas import tpu as pltpu


def _round_up(x, m):
    return ((x + m - 1) // m) * m


# ----------------------------------------------------------------------------
# Kernel
# ----------------------------------------------------------------------------
def _fused_kernel(text_ref, img_ref,
                  wl_ref, bl_ref,        # language Linear
                  wv_ref, bv_ref,        # vision Linear
                  wf_ref, bf_ref,        # fusion Linear
                  wc_ref, bc_ref,        # fc Linear
                  pred_ref,              # out: softmax probs (lane-padded classes)
                  t_acc_ref,             # VMEM f32 scratch: relu(language) features
                  v_acc_ref):            # VMEM f32 scratch: vision accumulator
    k = pl.program_id(1)

    @pl.when(k == 0)
    def _init():
        v_acc_ref[...] = jnp.zeros_like(v_acc_ref)
        # Language branch once per batch tile; hides under the Wv DMA stream.
        t = jnp.dot(text_ref[...], wl_ref[...],
                    preferred_element_type=jnp.float32)
        t_acc_ref[...] = jnp.maximum(t + bl_ref[...], 0.0)

    # Vision branch partial matmul over this K tile (bf16 in, f32 accumulate).
    v_acc_ref[...] += jnp.dot(img_ref[...], wv_ref[...],
                              preferred_element_type=jnp.float32)

    @pl.when(k == pl.num_programs(1) - 1)
    def _finalize():
        v = jnp.maximum(v_acc_ref[...] + bv_ref[...], 0.0)   # relu(vision)
        combined = t_acc_ref[...] * v                        # torch.mul fusion

        # fusion layer: relu(combined @ Wf + bf); dropout is identity (eval mode)
        fused = jnp.dot(combined.astype(jnp.bfloat16), wf_ref[...],
                        preferred_element_type=jnp.float32)
        fused = jnp.maximum(fused + bf_ref[...], 0.0)

        # classifier + softmax (padded class columns carry a -1e30 bias -> prob 0)
        logits = jnp.dot(fused.astype(jnp.bfloat16), wc_ref[...],
                         preferred_element_type=jnp.float32) + bc_ref[...]
        m = jnp.max(logits, axis=-1, keepdims=True)
        e = jnp.exp(logits - m)
        pred_ref[...] = e / jnp.sum(e, axis=-1, keepdims=True)


# ----------------------------------------------------------------------------
# One-time parameter preparation (hoisted out of the per-call path)
# ----------------------------------------------------------------------------
def _pad2(x, rows, cols, dtype, fill=0.0):
    x = x.astype(dtype)
    return jnp.pad(x, ((0, rows - x.shape[0]), (0, cols - x.shape[1])),
                   constant_values=fill)


def prepare_params(params, text_dim):
    """Pad/cast the weights once. Call this once; reuse the result per inference."""
    wl, bl = params["wl"], params["bl"]
    wv, bv = params["wv"], params["bv"]
    wf, bf = params["wf"], params["bf"]
    wc, bc = params["wc"], params["bc"]

    T = text_dim
    K = wv.shape[0]          # flattened vision input dim (C*H*W)
    F = wl.shape[1]          # feature_dim (language == vision per module assert)
    FU = wf.shape[1]         # fusion_output_size
    C = wc.shape[1]          # num_classes

    F_pad = _round_up(F, 128)
    FU_pad = _round_up(FU, 128)
    C_pad = _round_up(C, 128)
    K_pad128 = _round_up(K, 128)

    f32, bf16 = jnp.float32, jnp.bfloat16
    prepped = {
        "wl": _pad2(wl, T, F_pad, bf16),
        "bl": _pad2(bl.reshape(1, -1), 1, F_pad, f32),
        "wv": _pad2(wv, K_pad128, F_pad, bf16),          # dominant stream -> bf16
        "bv": _pad2(bv.reshape(1, -1), 1, F_pad, f32),
        "wf": _pad2(wf, F_pad, FU_pad, bf16),
        "bf": _pad2(bf.reshape(1, -1), 1, FU_pad, f32),
        "wc": _pad2(wc, FU_pad, C_pad, bf16),
        "bc": _pad2(bc.reshape(1, -1), 1, C_pad, f32, fill=-1e30),  # mask pad cols
    }
    dims = dict(T=T, K=K, F=F, FU=FU, C=C,
                F_pad=F_pad, FU_pad=FU_pad, C_pad=C_pad, K_pad128=K_pad128)
    return prepped, dims


# ----------------------------------------------------------------------------
# VMEM-aware tile selection
# ----------------------------------------------------------------------------
def _vmem_budget_bytes():
    cap = 64 * 1024 * 1024                       # conservative fallback (v7x)
    try:
        info = pltpu.get_tpu_info()
        cap = int(getattr(info, "vmem_capacity_bytes", cap))
    except Exception:
        pass
    return (3 * cap) // 4                         # leave headroom for the compiler


def _choose_tiles(B, K, T, F_pad, FU_pad, C_pad, budget, bm_max=256):
    bm = min(bm_max, _round_up(B, 16))            # bf16 native (16,128) tile
    # Keep >=2 "parallel" batch tiles when the batch allows it (v7x: 2 TCs/chip).
    if B >= 32 and _round_up(B, bm) // bm < 2:
        bm = _round_up((B + 1) // 2, 16)

    # Resident (non-K-streamed) VMEM, pessimistically double-buffered.
    resident = 2 * (
        bm * T * 2 +                                # text tile (bf16)
        T * F_pad * 2 + F_pad * 4 +                 # wl (bf16), bl (f32)
        F_pad * 4 +                                 # bv
        F_pad * FU_pad * 2 + FU_pad * 4 +           # wf, bf
        FU_pad * C_pad * 2 + C_pad * 4 +            # wc, bc
        bm * C_pad * 4                              # output tile (f32)
    ) + 2 * bm * F_pad * 4                          # t_acc + v_acc scratches

    stream_budget = max(budget - resident, 1 << 20)
    # Two double-buffered bf16 streams per K step: img (bm, tk) + wv (tk, F_pad).
    tk = stream_budget // (4 * (bm + F_pad))
    tk = max(128, min(16384, (tk // 128) * 128))
    tk = min(tk, _round_up(K, 128))
    return bm, tk


# ----------------------------------------------------------------------------
# Per-call wrapper
# ----------------------------------------------------------------------------
def language_and_vision_concat(text, image, prepped, dims, *, bm_max=256):
    """text: (B, T) f32; image: (B, C, H, W) f32 NCHW.  Returns (pred, loss=None)."""
    B, T = text.shape
    assert T == dims["T"]
    img_flat = image.reshape(B, -1)          # NCHW row-major flatten, like .view(B,-1)
    K = img_flat.shape[1]
    assert K == dims["K"]

    F_pad, FU_pad, C_pad = dims["F_pad"], dims["FU_pad"], dims["C_pad"]
    C = dims["C"]

    budget = _vmem_budget_bytes()
    bm, tk = _choose_tiles(B, K, T, F_pad, FU_pad, C_pad, budget, bm_max=bm_max)
    B_pad = _round_up(B, bm)
    K_pad = _round_up(_round_up(K, 128), tk)

    f32, bf16 = jnp.float32, jnp.bfloat16
    text_p = _pad2(text, B_pad, T, bf16)
    img_p = _pad2(img_flat, B_pad, K_pad, bf16)
    wv_p = prepped["wv"]
    if wv_p.shape[0] != K_pad:                     # pad Wv rows up to the tk grid
        wv_p = jnp.pad(wv_p, ((0, K_pad - wv_p.shape[0]), (0, 0)))

    grid = (B_pad // bm, K_pad // tk)

    pred_padded = pl.pallas_call(
        _fused_kernel,
        out_shape=jax.ShapeDtypeStruct((B_pad, C_pad), jnp.float32),
        grid=grid,
        in_specs=[
            pl.BlockSpec((bm, T),         lambda b, k: (b, 0)),   # text (resident over k)
            pl.BlockSpec((bm, tk),        lambda b, k: (b, k)),   # image tile
            pl.BlockSpec((T, F_pad),      lambda b, k: (0, 0)),   # Wl
            pl.BlockSpec((1, F_pad),      lambda b, k: (0, 0)),   # bl
            pl.BlockSpec((tk, F_pad),     lambda b, k: (k, 0)),   # Wv tile (dominant)
            pl.BlockSpec((1, F_pad),      lambda b, k: (0, 0)),   # bv
            pl.BlockSpec((F_pad, FU_pad), lambda b, k: (0, 0)),   # Wf
            pl.BlockSpec((1, FU_pad),     lambda b, k: (0, 0)),   # bf
            pl.BlockSpec((FU_pad, C_pad), lambda b, k: (0, 0)),   # Wc
            pl.BlockSpec((1, C_pad),      lambda b, k: (0, 0)),   # bc
        ],
        out_specs=pl.BlockSpec((bm, C_pad), lambda b, k: (b, 0)),
        scratch_shapes=[pltpu.VMEM((bm, F_pad), jnp.float32),     # t_acc
                        pltpu.VMEM((bm, F_pad), jnp.float32)],    # v_acc
        compiler_params=pltpu.CompilerParams(
            dimension_semantics=("parallel", "arbitrary"),
            vmem_limit_bytes=int(budget),
        ),
    )(text_p, img_p,
      prepped["wl"], prepped["bl"], wv_p, prepped["bv"],
      prepped["wf"], prepped["bf"], prepped["wc"], prepped["bc"])

    pred = pred_padded[:B, :C]
    loss = None   # label is None -> loss is None, as in the PyTorch forward
    return pred, loss


# ----------------------------------------------------------------------------
# Parameter init + pure-JAX reference (mirrors the kernel's bf16 rounding)
# ----------------------------------------------------------------------------
def init_params(key, text_dim, vision_in_dim, feature_dim,
                fusion_output_size, num_classes):
    ks = jax.random.split(key, 8)
    scale = 0.05
    return {
        "wl": scale * jax.random.normal(ks[0], (text_dim, feature_dim), jnp.float32),
        "bl": scale * jax.random.normal(ks[1], (feature_dim,), jnp.float32),
        "wv": scale * jax.random.normal(ks[2], (vision_in_dim, feature_dim), jnp.float32),
        "bv": scale * jax.random.normal(ks[3], (feature_dim,), jnp.float32),
        "wf": scale * jax.random.normal(ks[4], (feature_dim, fusion_output_size), jnp.float32),
        "bf": scale * jax.random.normal(ks[5], (fusion_output_size,), jnp.float32),
        "wc": scale * jax.random.normal(ks[6], (fusion_output_size, num_classes), jnp.float32),
        "bc": scale * jax.random.normal(ks[7], (num_classes,), jnp.float32),
    }


def _reference(text, image, params):
    bf, f32 = jnp.bfloat16, jnp.float32
    B = text.shape[0]
    img = image.reshape(B, -1).astype(bf).astype(f32)
    txt = text.astype(bf).astype(f32)
    wl = params["wl"].astype(bf).astype(f32)
    wv = params["wv"].astype(bf).astype(f32)
    wf = params["wf"].astype(bf).astype(f32)
    wc = params["wc"].astype(bf).astype(f32)
    t = jax.nn.relu(txt @ wl + params["bl"])
    v = jax.nn.relu(img @ wv + params["bv"])
    combined = t * v
    fused = jax.nn.relu(combined.astype(bf).astype(f32) @ wf + params["bf"])
    logits = fused.astype(bf).astype(f32) @ wc + params["bc"]
    return jax.nn.softmax(logits, axis=-1)


if __name__ == "__main__":
    key = jax.random.PRNGKey(0)
    B, T_DIM = 2, 32
    C, H, W = 4, 16, 16
    FEATURE_DIM = 64          # language_feature_dim == vision_feature_dim
    FUSION_OUT = 32
    NUM_CLASSES = 4

    k_text, k_img, k_params = jax.random.split(key, 3)
    text = jax.random.normal(k_text, (B, T_DIM), jnp.float32)
    image = jax.random.normal(k_img, (B, C, H, W), jnp.float32)
    params = init_params(k_params, T_DIM, C * H * W, FEATURE_DIM,
                         FUSION_OUT, NUM_CLASSES)

    # One-time weight prep (padding + bf16 cast), reused across inference calls.
    prepped, dims = prepare_params(params, T_DIM)
    prepped = jax.tree_util.tree_map(jax.block_until_ready, prepped)

    pred, loss = language_and_vision_concat(text, image, prepped, dims)
    pred = jax.block_until_ready(pred)

    assert pred.shape == (B, NUM_CLASSES)
    assert loss is None
    assert jnp.allclose(jnp.sum(pred, axis=-1), 1.0, atol=1e-3)
    ref = _reference(text, image, params)
    assert jnp.allclose(pred, ref, atol=1e-2), float(jnp.max(jnp.abs(pred - ref)))
    print("KERNEL_OK")
</pallas_src>

<mosaic_0001>
module attributes {stable_mosaic.version = 11 : i64} {
  func.func @_fused_kernel(%arg0: i32, %arg1: i32, %arg2: memref<16x32xbf16, #tpu.memory_space<vmem>>, %arg3: memref<16x1024xbf16, #tpu.memory_space<vmem>>, %arg4: memref<32x128xbf16, #tpu.memory_space<vmem>>, %arg5: memref<1x128xf32, #tpu.memory_space<vmem>>, %arg6: memref<1024x128xbf16, #tpu.memory_space<vmem>>, %arg7: memref<1x128xf32, #tpu.memory_space<vmem>>, %arg8: memref<128x128xbf16, #tpu.memory_space<vmem>>, %arg9: memref<1x128xf32, #tpu.memory_space<vmem>>, %arg10: memref<128x128xbf16, #tpu.memory_space<vmem>>, %arg11: memref<1x128xf32, #tpu.memory_space<vmem>>, %arg12: memref<16x128xf32, #tpu.memory_space<vmem>>, %arg13: memref<16x128xf32, #tpu.memory_space<vmem>>, %arg14: memref<16x128xf32, #tpu.memory_space<vmem>>) attributes {dimension_semantics = [#tpu.dimension_semantics<parallel>, #tpu.dimension_semantics<arbitrary>], iteration_bounds = array<i64: 1, 1>, scalar_prefetch = 0 : i64, scratch_operands = 2 : i64, tpu.core_type = #tpu.core_type<tc>, window_params = [{transform_indices = @transform_0, window_bounds = array<i64: 16, 32>}, {transform_indices = @transform_1, window_bounds = array<i64: 16, 1024>}, {pipeline_mode = #tpu.pipeline_mode<synchronous>, transform_indices = @transform_2, window_bounds = array<i64: 32, 128>}, {pipeline_mode = #tpu.pipeline_mode<synchronous>, transform_indices = @transform_3, window_bounds = array<i64: 1, 128>}, {transform_indices = @transform_4, window_bounds = array<i64: 1024, 128>}, {pipeline_mode = #tpu.pipeline_mode<synchronous>, transform_indices = @transform_5, window_bounds = array<i64: 1, 128>}, {pipeline_mode = #tpu.pipeline_mode<synchronous>, transform_indices = @transform_6, window_bounds = array<i64: 128, 128>}, {pipeline_mode = #tpu.pipeline_mode<synchronous>, transform_indices = @transform_7, window_bounds = array<i64: 1, 128>}, {pipeline_mode = #tpu.pipeline_mode<synchronous>, transform_indices = @transform_8, window_bounds = array<i64: 128, 128>}, {pipeline_mode = #tpu.pipeline_mode<synchronous>, transform_indices = @transform_9, window_bounds = array<i64: 1, 128>}, {transform_indices = @transform_10, window_bounds = array<i64: 16, 128>}]} {
    %c0_i32 = arith.constant 0 : i32
    %0 = arith.cmpi eq, %arg1, %c0_i32 : i32
    %1 = arith.extui %0 : i1 to i32
    %c0_i32_0 = arith.constant 0 : i32
    %2 = arith.cmpi ne, %1, %c0_i32_0 : i32
    scf.if %2 {
      %cst_10 = arith.constant 0.000000e+00 : f32
      %12 = vector.broadcast %cst_10 : f32 to vector<16x128xf32>
      %c0_11 = arith.constant 0 : index
      %c0_12 = arith.constant 0 : index
      %13 = vector.load %arg14[%c0_11, %c0_12] : memref<16x128xf32, #tpu.memory_space<vmem>>, vector<16x128xf32>
      tpu.vector_store %arg14[%c0_11, %c0_12], %12 {strides = array<i32>} : memref<16x128xf32, #tpu.memory_space<vmem>>, vector<16x128xf32>,
      %c0_13 = arith.constant 0 : index
      %c0_14 = arith.constant 0 : index
      %14 = vector.load %arg2[%c0_13, %c0_14] : memref<16x32xbf16, #tpu.memory_space<vmem>>, vector<16x32xbf16>
      %c0_15 = arith.constant 0 : index
      %c0_16 = arith.constant 0 : index
      %15 = vector.load %arg4[%c0_15, %c0_16] : memref<32x128xbf16, #tpu.memory_space<vmem>>, vector<32x128xbf16>
      %cst_17 = arith.constant dense<0.000000e+00> : vector<16x128xf32>
      %16 = tpu.matmul %14, %15, %cst_17 {dimension_numbers = #tpu.dot_dimension_numbers<[1], [0], [0], [1], [0, 0, 1, 1], [], []>} : vector<16x32xbf16>, vector<32x128xbf16>, vector<16x128xf32> -> vector<16x128xf32>
      %c0_18 = arith.constant 0 : index
      %c0_19 = arith.constant 0 : index
      %17 = vector.load %arg5[%c0_18, %c0_19] : memref<1x128xf32, #tpu.memory_space<vmem>>, vector<1x128xf32>
      %18 = vector.broadcast %17 : vector<1x128xf32> to vector<16x128xf32>
      %19 = arith.addf %16, %18 : vector<16x128xf32>
      %cst_20 = arith.constant 0.000000e+00 : f32
      %20 = vector.broadcast %cst_20 : f32 to vector<16x128xf32>
      %21 = arith.maximumf %19, %20 : vector<16x128xf32>
      %c0_21 = arith.constant 0 : index
      %c0_22 = arith.constant 0 : index
      %22 = vector.load %arg13[%c0_21, %c0_22] : memref<16x128xf32, #tpu.memory_space<vmem>>, vector<16x128xf32>
      tpu.vector_store %arg13[%c0_21, %c0_22], %21 {strides = array<i32>} : memref<16x128xf32, #tpu.memory_space<vmem>>, vector<16x128xf32>,
    } else {
    }
    %c0 = arith.constant 0 : index
    %c0_1 = arith.constant 0 : index
    %3 = vector.load %arg14[%c0, %c0_1] : memref<16x128xf32, #tpu.memory_space<vmem>>, vector<16x128xf32>
    %c0_2 = arith.constant 0 : index
    %c0_3 = arith.constant 0 : index
    %4 = vector.load %arg3[%c0_2, %c0_3] : memref<16x1024xbf16, #tpu.memory_space<vmem>>, vector<16x1024xbf16>
    %c0_4 = arith.constant 0 : index
    %c0_5 = arith.constant 0 : index
    %5 = vector.load %arg6[%c0_4, %c0_5] : memref<1024x128xbf16, #tpu.memory_space<vmem>>, vector<1024x128xbf16>
    %cst = arith.constant dense<0.000000e+00> : vector<16x128xf32>
    %6 = tpu.matmul %4, %5, %cst {dimension_numbers = #tpu.dot_dimension_numbers<[1], [0], [0], [1], [0, 0, 1, 1], [], []>} : vector<16x1024xbf16>, vector<1024x128xbf16>, vector<16x128xf32> -> vector<16x128xf32>
    %7 = arith.addf %3, %6 : vector<16x128xf32>
    %c0_6 = arith.constant 0 : index
    %c0_7 = arith.constant 0 : index
    %8 = vector.load %arg14[%c0_6, %c0_7] : memref<16x128xf32, #tpu.memory_space<vmem>>, vector<16x128xf32>
    tpu.vector_store %arg14[%c0_6, %c0_7], %7 {strides = array<i32>} : memref<16x128xf32, #tpu.memory_space<vmem>>, vector<16x128xf32>,
    %c0_i32_8 = arith.constant 0 : i32
    %9 = arith.cmpi eq, %arg1, %c0_i32_8 : i32
    %10 = arith.extui %9 : i1 to i32
    %c0_i32_9 = arith.constant 0 : i32
    %11 = arith.cmpi ne, %10, %c0_i32_9 : i32
    scf.if %11 {
      %c0_10 = arith.constant 0 : index
      %c0_11 = arith.constant 0 : index
      %12 = vector.load %arg14[%c0_10, %c0_11] : memref<16x128xf32, #tpu.memory_space<vmem>>, vector<16x128xf32>
      %c0_12 = arith.constant 0 : index
      %c0_13 = arith.constant 0 : index
      %13 = vector.load %arg7[%c0_12, %c0_13] : memref<1x128xf32, #tpu.memory_space<vmem>>, vector<1x128xf32>
      %14 = vector.broadcast %13 : vector<1x128xf32> to vector<16x128xf32>
      %15 = arith.addf %12, %14 : vector<16x128xf32>
      %cst_14 = arith.constant 0.000000e+00 : f32
      %16 = vector.broadcast %cst_14 : f32 to vector<16x128xf32>
      %17 = arith.maximumf %15, %16 : vector<16x128xf32>
      %c0_15 = arith.constant 0 : index
      %c0_16 = arith.constant 0 : index
      %18 = vector.load %arg13[%c0_15, %c0_16] : memref<16x128xf32, #tpu.memory_space<vmem>>, vector<16x128xf32>
      %19 = arith.mulf %18, %17 : vector<16x128xf32>
      %20 = arith.truncf %19 : vector<16x128xf32> to vector<16x128xbf16>
      %c0_17 = arith.constant 0 : index
      %c0_18 = arith.constant 0 : index
      %21 = vector.load %arg8[%c0_17, %c0_18] : memref<128x128xbf16, #tpu.memory_space<vmem>>, vector<128x128xbf16>
      %cst_19 = arith.constant dense<0.000000e+00> : vector<16x128xf32>
      %22 = tpu.matmul %20, %21, %cst_19 {dimension_numbers = #tpu.dot_dimension_numbers<[1], [0], [0], [1], [0, 0, 1, 1], [], []>} : vector<16x128xbf16>, vector<128x128xbf16>, vector<16x128xf32> -> vector<16x128xf32>
      %c0_20 = arith.constant 0 : index
      %c0_21 = arith.constant 0 : index
      %23 = vector.load %arg9[%c0_20, %c0_21] : memref<1x128xf32, #tpu.memory_space<vmem>>, vector<1x128xf32>
      %24 = vector.broadcast %23 : vector<1x128xf32> to vector<16x128xf32>
      %25 = arith.addf %22, %24 : vector<16x128xf32>
      %cst_22 = arith.constant 0.000000e+00 : f32
      %26 = vector.broadcast %cst_22 : f32 to vector<16x128xf32>
      %27 = arith.maximumf %25, %26 : vector<16x128xf32>
      %28 = arith.truncf %27 : vector<16x128xf32> to vector<16x128xbf16>
      %c0_23 = arith.constant 0 : index
      %c0_24 = arith.constant 0 : index
      %29 = vector.load %arg10[%c0_23, %c0_24] : memref<128x128xbf16, #tpu.memory_space<vmem>>, vector<128x128xbf16>
      %cst_25 = arith.constant dense<0.000000e+00> : vector<16x128xf32>
      %30 = tpu.matmul %28, %29, %cst_25 {dimension_numbers = #tpu.dot_dimension_numbers<[1], [0], [0], [1], [0, 0, 1, 1], [], []>} : vector<16x128xbf16>, vector<128x128xbf16>, vector<16x128xf32> -> vector<16x128xf32>
      %c0_26 = arith.constant 0 : index
      %c0_27 = arith.constant 0 : index
      %31 = vector.load %arg11[%c0_26, %c0_27] : memref<1x128xf32, #tpu.memory_space<vmem>>, vector<1x128xf32>
      %32 = vector.broadcast %31 : vector<1x128xf32> to vector<16x128xf32>
      %33 = arith.addf %30, %32 : vector<16x128xf32>
      %cst_28 = arith.constant dense<0xFF800000> : vector<16xf32>
      %34 = vector.multi_reduction <maximumf>, %33, %cst_28 [1] : vector<16x128xf32> to vector<16xf32>
      %35 = vector.shape_cast %34 : vector<16xf32> to vector<16x1xf32>
      %36 = vector.broadcast %35 : vector<16x1xf32> to vector<16x128xf32>
      %37 = arith.subf %33, %36 : vector<16x128xf32>
      %38 = math.exp %37 : vector<16x128xf32>
      %cst_29 = arith.constant dense<0.000000e+00> : vector<16xf32>
      %39 = vector.multi_reduction <add>, %38, %cst_29 [1] : vector<16x128xf32> to vector<16xf32>
      %40 = vector.shape_cast %39 : vector<16xf32> to vector<16x1xf32>
      %41 = vector.broadcast %40 : vector<16x1xf32> to vector<16x128xf32>
      %42 = arith.divf %38, %41 : vector<16x128xf32>
      %c0_30 = arith.constant 0 : index
      %c0_31 = arith.constant 0 : index
      %43 = vector.load %arg12[%c0_30, %c0_31] : memref<16x128xf32, #tpu.memory_space<vmem>>, vector<16x128xf32>
      tpu.vector_store %arg12[%c0_30, %c0_31], %42 {strides = array<i32>} : memref<16x128xf32, #tpu.memory_space<vmem>>, vector<16x128xf32>,
    } else {
    }
    return
  }
  func.func @transform_0(%arg0: i32, %arg1: i32) -> (i32, i32) {
    %c0_i32 = arith.constant 0 : i32
    %c0_i32_0 = arith.constant 0 : i32
    return %arg0, %c0_i32 : i32, i32
  }
  func.func @transform_1(%arg0: i32, %arg1: i32) -> (i32, i32) {
    %c0_i32 = arith.constant 0 : i32
    return %arg0, %arg1 : i32, i32
  }
  func.func @transform_2(%arg0: i32, %arg1: i32) -> (i32, i32) {
    %c0_i32 = arith.constant 0 : i32
    %c0_i32_0 = arith.constant 0 : i32
    %c0_i32_1 = arith.constant 0 : i32
    return %c0_i32, %c0_i32_0 : i32, i32
  }
  func.func @transform_3(%arg0: i32, %arg1: i32) -> (i32, i32) {
    %c0_i32 = arith.constant 0 : i32
    %c0_i32_0 = arith.constant 0 : i32
    %c0_i32_1 = arith.constant 0 : i32
    return %c0_i32, %c0_i32_0 : i32, i32
  }
  func.func @transform_4(%arg0: i32, %arg1: i32) -> (i32, i32) {
    %c0_i32 = arith.constant 0 : i32
    %c0_i32_0 = arith.constant 0 : i32
    return %arg1, %c0_i32 : i32, i32
  }
  func.func @transform_5(%arg0: i32, %arg1: i32) -> (i32, i32) {
    %c0_i32 = arith.constant 0 : i32
    %c0_i32_0 = arith.constant 0 : i32
    %c0_i32_1 = arith.constant 0 : i32
    return %c0_i32, %c0_i32_0 : i32, i32
  }
  func.func @transform_6(%arg0: i32, %arg1: i32) -> (i32, i32) {
    %c0_i32 = arith.constant 0 : i32
    %c0_i32_0 = arith.constant 0 : i32
    %c0_i32_1 = arith.constant 0 : i32
    return %c0_i32, %c0_i32_0 : i32, i32
  }
  func.func @transform_7(%arg0: i32, %arg1: i32) -> (i32, i32) {
    %c0_i32 = arith.constant 0 : i32
    %c0_i32_0 = arith.constant 0 : i32
    %c0_i32_1 = arith.constant 0 : i32
    return %c0_i32, %c0_i32_0 : i32, i32
  }
  func.func @transform_8(%arg0: i32, %arg1: i32) -> (i32, i32) {
    %c0_i32 = arith.constant 0 : i32
    %c0_i32_0 = arith.constant 0 : i32
    %c0_i32_1 = arith.constant 0 : i32
    return %c0_i32, %c0_i32_0 : i32, i32
  }
  func.func @transform_9(%arg0: i32, %arg1: i32) -> (i32, i32) {
    %c0_i32 = arith.constant 0 : i32
    %c0_i32_0 = arith.constant 0 : i32
    %c0_i32_1 = arith.constant 0 : i32
    return %c0_i32, %c0_i32_0 : i32, i32
  }
  func.func @transform_10(%arg0: i32, %arg1: i32) -> (i32, i32) {
    %c0_i32 = arith.constant 0 : i32
    %c0_i32_0 = arith.constant 0 : i32
    return %arg0, %c0_i32 : i32, i32
  }
}

</mosaic_0001>

<bundles_post_ra>
// kernel: tpu_custom_call.1
= control target key start
LH: loop header
LB: loop body
LE: loop exit
PB: predicated region body
PF: predicated region fallthrough
CT: control target
= control target key end

     0   :  { %15 = vsyncpa [#allocation5], 0  ;;  %s1877_s0 = inlined_call_operand.hbm [shape: bf16[16,32], index: 0, kind: input, shape index: {}]   ;;  %s1878_s1 = inlined_call_operand.hbm [shape: bf16[16,1024], index: 1, kind: input, shape index: {}]   ;;  %s1879_s2 = inlined_call_operand.hbm [shape: bf16[32,128], index: 2, kind: input, shape index: {}]   ;;  %s1880_s3 = inlined_call_operand.vmem [shape: f32[1,128], index: 3, kind: input, shape index: {}]   ;;  %s1881_s4 = inlined_call_operand.hbm [shape: bf16[1024,128], index: 4, kind: input, shape index: {}]   ;;  %s1882_s5 = inlined_call_operand.vmem [shape: f32[1,128], index: 5, kind: input, shape index: {}]   ;;  %s1883_s6 = inlined_call_operand.hbm [shape: bf16[128,128], index: 6, kind: input, shape index: {}]   ;;  %s1884_s7 = inlined_call_operand.vmem [shape: f32[1,128], index: 7, kind: input, shape index: {}]   ;;  %s1885_s8 = inlined_call_operand.hbm [shape: bf16[128,128], index: 8, kind: input, shape index: {}]   ;;  %s1886_s9 = inlined_call_operand.vmem [shape: f32[1,128], index: 9, kind: input, shape index: {}]   ;;  %s1887_s10 = inlined_call_operand.hbm [shape: f32[16,128], index: 10, kind: output, shape index: {}]  }
   0x1   :  { %16 = vsyncpa [#allocation8], 0 }
   0x2   :  { %17 = vsyncpa [#allocation11], 0 }
   0x3   :  { %18 = vsyncpa [#allocation14], 0  ;;  %s37_s15 = sshll.u32 %s1878_s1, 4  ;;  %s38_s15 = int_to_ptr.hbm [resolvable:$true] %s37_s15 }
   0x4   :  { %19 = vsyncpa [#allocation6], 0  ;;  %s1776_s16 = smov [#allocation7]   ;;  %s1777_s18 = smov 512  }
   0x5   :  { %s39_s17 = sshll.u32 %s1776_s16, 4  ;;  %s1778_s19 = smov 32   ;;  %s40_s17 = int_to_ptr.vmem [resolvable:$true] %s39_s17 }
   0x6   :  { %45 = dma.hbm_to_vmem [thread:$0]  %s38_s15, 1024, %s40_s17, [#allocation8], %s1777_s18, %s1777_s18, %s1778_s19  }
   0x7   :  { %s65_s22 = sshll.u32 %s1881_s4, 4  ;;  %s1779_s23 = smov [#allocation10]   ;;  %s66_s22 = int_to_ptr.hbm [resolvable:$true] %s65_s22 }
   0x8   :  { %s67_s24 = sshll.u32 %s1779_s23, 4  ;;  %s24_s27 = sshll.u32 %s1877_s0, 4  ;;  %s68_s24 = int_to_ptr.vmem [resolvable:$true] %s67_s24  ;;  %s25_s27 = int_to_ptr.hbm [resolvable:$true] %s24_s27 }
   0x9   :  { %s1780_s1 = smov 64   ;;  %s1781_s28 = smov 4  }
   0xa   :  { %73 = dma.hbm_to_vmem [thread:$0]  %s66_s22, 8192, %s68_s24, [#allocation11], %s1780_s1, %s1780_s1, %s1781_s28  }
   0xb   :  { %s50_s11 = sshll.u32 %s1879_s2, 4  ;;  %s1782_s12 = smov [#allocation4]   ;;  %s51_s11 = int_to_ptr.hbm [resolvable:$true] %s50_s11 }
   0xc   :  { %s26_s13 = sshll.u32 %s1782_s12, 4  ;;  %s1783_s4 = smov [#allocation9]   ;;  %s27_s13 = int_to_ptr.vmem [resolvable:$true] %s26_s13 }
   0xd   :  { %32 = dma.hbm_to_vmem [thread:$0]  %s25_s27, 128, %s27_s13, [#allocation5], %s1780_s1, %s1780_s1, %s1781_s28  }
   0xe   :  { %s52_s14 = sshll.u32 %s1783_s4, 4  ;;  %s80_s0 = sshll.u32 %s1883_s6, 4  ;;  %s53_s14 = int_to_ptr.vmem [resolvable:$true] %s52_s14  ;;  %s81_s0 = int_to_ptr.hbm [resolvable:$true] %s80_s0 }
   0xf   :  { %58 = dma.hbm_to_vmem [thread:$0]  %s51_s11, 256, %s53_s14, [#allocation8], %s1780_s1, %s1780_s1, %s1781_s28  }
  0x10   :  { %s95_s19 = sshll.u32 %s1885_s8, 4  ;;  %s1784_s20 = smov [#allocation12]   ;;  %s96_s19 = int_to_ptr.hbm [resolvable:$true] %s95_s19 }
  0x11   :  { %s82_s2 = sshll.u32 %s1784_s20, 4  ;;  %s1785_s21 = smov [#allocation13]   ;;  %s83_s2 = int_to_ptr.vmem [resolvable:$true] %s82_s2 }
  0x12   :  { %88 = dma.hbm_to_vmem [thread:$0]  %s81_s0, 1024, %s83_s2, [#allocation11], %s1780_s1, %s1780_s1, %s1781_s28  }
  0x13   :  { %s97_s22 = sshll.u32 %s1785_s21, 4  ;;  %s98_s22 = int_to_ptr.vmem [resolvable:$true] %s97_s22 }
  0x14   :  { %103 = dma.hbm_to_vmem [thread:$0]  %s96_s19, 1024, %s98_s22, [#allocation14], %s1780_s1, %s1780_s1, %s1781_s28  }
  0x15   :  { %1766 = dma.done.wait [#allocation5], 128  }
  0x16   :  { %1767 = vsyncadd [#allocation5], 4294967168 }
  0x17   :  { %1768 = dma.done.wait [#allocation8], 1280  }
  0x18   :  { %1769 = vsyncadd [#allocation8], 4294966016 }
  0x19   :  { %1770 = dma.done.wait [#allocation11], 9216  }
  0x1a   :  { %1771 = vsyncadd [#allocation11], 4294958080 }
  0x1b   :  { %1772 = dma.done.wait [#allocation14], 1024  }
  0x1c   :  { %1773 = vsyncadd [#allocation14], 4294966272  ;;  %v1484_v0 = vld [vmem:[#allocation9 + $0x8] sm:$0xff]  ;;  %v1483_v4 = vld [vmem:[#allocation9] sm:$0xff]  ;;  %vm164_vm0 = vcmask 261120   ;;  %s1101_s28 = sshll.u32 %s1887_s10, 4  ;;  %s1102_s28 = int_to_ptr.hbm [resolvable:$true] %s1101_s28 }
  0x1d   :  { %v1500_v1 = vld [vmem:[#allocation10 + $0x38] sm:$0xff]  ;;  %174 = vmatpush.bf16.msra.mxu0 %v1484_v0  ;;  %v1499_v5 = vld [vmem:[#allocation10 + $0x30] sm:$0xff]  ;;  %v1498_v9 = vld [vmem:[#allocation10 + $0x28] sm:$0xff]  ;;  %s1787_s29 = smov 128   ;;  %s1788_s30 = smov 8  }
  0x1e   :  { %v1508_v2 = vld [vmem:[#allocation10 + $0x78] sm:$0xff]  ;;  %748 = vmatpush.bf16.msra.mxu1 %v1500_v1  ;;  %v1507_v6 = vld [vmem:[#allocation10 + $0x70] sm:$0xff]  ;;  %v1506_v10 = vld [vmem:[#allocation10 + $0x68] sm:$0xff] }
  0x1f   :  { %v1516_v3 = vld [vmem:[#allocation10 + $0xb8] sm:$0xff]  ;;  %762 = vmatpush.bf16.msra.mxu2 %v1508_v2  ;;  %v1515_v7 = vld [vmem:[#allocation10 + $0xb0] sm:$0xff]  ;;  %v1514_v11 = vld [vmem:[#allocation10 + $0xa8] sm:$0xff] }
  0x20   :  { %776 = vmatpush.bf16.msra.mxu3 %v1516_v3  ;;  %v1524_v8 = vld [vmem:[#allocation10 + $0xf8] sm:$0xff]  ;;  %v1523_v12 = vld [vmem:[#allocation10 + $0xf0] sm:$0xff]  ;;  %v1482_v13 = vld [vmem:[#allocation4] sm:$0xff] }
  0x21   :  { %175 = vmatpush.bf16.msra.mxu0 %v1483_v4  ;;  %v1497_v14 = vld [vmem:[#allocation10 + $0x20] sm:$0xff]  ;;  %v1522_v17 = vld [vmem:[#allocation10 + $0xe8] sm:$0xff]  ;;  %v1496_v18 = vld [vmem:[#allocation10 + $0x18] sm:$0xff] }
  0x22   :  { %749 = vmatpush.bf16.msra.mxu1 %v1499_v5  ;;  %v1505_v15 = vld [vmem:[#allocation10 + $0x60] sm:$0xff]  ;;  %v1504_v19 = vld [vmem:[#allocation10 + $0x58] sm:$0xff]  ;;  %v1495_v22 = vld [vmem:[#allocation10 + $0x10] sm:$0xff] }
  0x23   :  { %763 = vmatpush.bf16.msra.mxu2 %v1507_v6  ;;  %v1513_v16 = vld [vmem:[#allocation10 + $0xa0] sm:$0xff]  ;;  %v1512_v20 = vld [vmem:[#allocation10 + $0x98] sm:$0xff]  ;;  %v1503_v23 = vld [vmem:[#allocation10 + $0x50] sm:$0xff] }
  0x24   :  { %777 = vmatpush.bf16.msra.mxu3 %v1515_v7  ;;  %1129 = vmatmul.msk.bf16.vlgmr.msra.gmra.mxu0 %vm164_vm0, %v1482_v13  ;;  %v1521_v21 = vld [vmem:[#allocation10 + $0xe0] sm:$0xff]  ;;  %v1511_v24 = vld [vmem:[#allocation10 + $0x90] sm:$0xff]  ;;  %v1520_v25 = vld [vmem:[#allocation10 + $0xd8] sm:$0xff] }
  0x25   :  { %790 = vmatpush.bf16.msrb.mxu0 %v1524_v8  ;;  %v1494_v26 = vld [vmem:[#allocation10 + $0x8] sm:$0xff]  ;;  %v1519_v29 = vld [vmem:[#allocation10 + $0xd0] sm:$0xff]  ;;  %v1493_v30 = vld [vmem:[#allocation10] sm:$0xff] }
  0x26   :  { %750 = vmatpush.bf16.msra.mxu1 %v1498_v9  ;;  %v1502_v27 = vld [vmem:[#allocation10 + $0x48] sm:$0xff]  ;;  %v1501_v31 = vld [vmem:[#allocation10 + $0x40] sm:$0xff]  ;;  %v1485_v34 = vld [vmem:[#allocation7 + $0x4] sm:$0xf] }
  0x27   :  { %764 = vmatpush.bf16.msra.mxu2 %v1506_v10  ;;  %v1510_v28 = vld [vmem:[#allocation10 + $0x88] sm:$0xff]  ;;  %v1509_v32 = vld [vmem:[#allocation10 + $0x80] sm:$0xff]  ;;  %v1134_v35 = vld [vmem:[#allocation7 + $0x20] sm:$0xf0] }
  0x28   :  { %778 = vmatpush.bf16.msra.mxu3 %v1514_v11  ;;  %v1518_v33 = vld [vmem:[#allocation10 + $0xc8] sm:$0xff]  ;;  %v1140_v36 = vld [vmem:[#allocation7 + $0x8] sm:$0xf]  ;;  %v1132_v39 = vld [vmem:[#allocation7] sm:$0xf]  ;;  %v1137_v43 = vor.u32 %v1485_v34, %v1134_v35 }
  0x29   :  { %791 = vmatpush.bf16.msrb.mxu0 %v1523_v12  ;;  %v1490_v37 = vld [vmem:[#allocation7 + $0x24] sm:$0xf0]  ;;  %v1489_v40 = vld [vmem:[#allocation7 + $0x1c] sm:$0xf0]  ;;  %v1517_v45 = vld [vmem:[#allocation10 + $0xc0] sm:$0xff] }
  0x2a   :  { %751 = vmatpush.bf16.msra.mxu1 %v1497_v14  ;;  %v1532_v38 = vld [vmem:[#allocation10 + $0x138] sm:$0xff]  ;;  %v1141_v44 = vor.u32 %v1490_v37, %v1140_v36  ;;  %v1133_v46 = vor.u32 %v1489_v40, %v1132_v39  ;;  %v1531_v47 = vld [vmem:[#allocation10 + $0x130] sm:$0xff]  ;;  %v1530_v54 = vld [vmem:[#allocation10 + $0x128] sm:$0xff] }
  0x2b   :  { %765 = vmatpush.bf16.msra.mxu2 %v1505_v15  ;;  %v1540_v41 = vld [vmem:[#allocation10 + $0x178] sm:$0xff]  ;;  %v1539_v50 = vld [vmem:[#allocation10 + $0x170] sm:$0xff]  ;;  %v1538_v55 = vld [vmem:[#allocation10 + $0x168] sm:$0xff] }
  0x2c   :  { %779 = vmatpush.bf16.msra.mxu3 %v1513_v16  ;;  %v1548_v42 = vld [vmem:[#allocation10 + $0x1b8] sm:$0xff]  ;;  %v1547_v51 = vld [vmem:[#allocation10 + $0x1b0] sm:$0xff]  ;;  %v1546_v56 = vld [vmem:[#allocation10 + $0x1a8] sm:$0xff] }
  0x2d   :  { %792 = vmatpush.bf16.msrb.mxu0 %v1522_v17  ;;  %v1486_v48 = vld [vmem:[#allocation7 + $0xc] sm:$0xf]  ;;  %v1555_v57 = vld [vmem:[#allocation10 + $0x1f0] sm:$0xff]  ;;  %v1529_v58 = vld [vmem:[#allocation10 + $0x120] sm:$0xff] }
  0x2e   :  { %752 = vmatpush.bf16.msra.mxu1 %v1496_v18  ;;  %v1142_v49 = vld [vmem:[#allocation7 + $0x28] sm:$0xf0]  ;;  %v1537_v59 = vld [vmem:[#allocation10 + $0x160] sm:$0xff]  ;;  %v1554_v61 = vld [vmem:[#allocation10 + $0x1e8] sm:$0xff] }
  0x2f   :  { %766 = vmatpush.bf16.msra.mxu2 %v1504_v19  ;;  %v1556_v52 = vld [vmem:[#allocation10 + $0x1f8] sm:$0xff]  ;;  %v1145_v53 = vor.u32 %v1486_v48, %v1142_v49  ;;  %v1545_v60 = vld [vmem:[#allocation10 + $0x1a0] sm:$0xff]  ;;  %v1527_v2 = vld [vmem:[#allocation10 + $0x110] sm:$0xff] }
  0x30   :  { %780 = vmatpush.bf16.msra.mxu3 %v1512_v20  ;;  %v1528_v62 = vld [vmem:[#allocation10 + $0x118] sm:$0xff]  ;;  %v1553_v1 = vld [vmem:[#allocation10 + $0x1e0] sm:$0xff]  ;;  %v1535_v3 = vld [vmem:[#allocation10 + $0x150] sm:$0xff] }
  0x31   :  { %793 = vmatpush.bf16.msrb.mxu0 %v1521_v21  ;;  %v1536_v63 = vld [vmem:[#allocation10 + $0x158] sm:$0xff]  ;;  %v1543_v4 = vld [vmem:[#allocation10 + $0x190] sm:$0xff]  ;;  %v1526_v6 = vld [vmem:[#allocation10 + $0x108] sm:$0xff] }
  0x32   :  { %753 = vmatpush.bf16.msra.mxu1 %v1495_v22  ;;  %v1544_v0 = vld [vmem:[#allocation10 + $0x198] sm:$0xff]  ;;  %v1534_v7 = vld [vmem:[#allocation10 + $0x148] sm:$0xff]  ;;  %v1551_v9 = vld [vmem:[#allocation10 + $0x1d0] sm:$0xff] }
  0x33   :  { %767 = vmatpush.bf16.msra.mxu2 %v1503_v23  ;;  %v1552_v5 = vld [vmem:[#allocation10 + $0x1d8] sm:$0xff]  ;;  %v1542_v8 = vld [vmem:[#allocation10 + $0x188] sm:$0xff]  ;;  %v1525_v10 = vld [vmem:[#allocation10 + $0x100] sm:$0xff] }
  0x34   :  { %781 = vmatpush.bf16.msra.mxu3 %v1511_v24  ;;  %v1533_v11 = vld [vmem:[#allocation10 + $0x140] sm:$0xff]  ;;  %v1156_v17 = vld [vmem:[#allocation7 + $0x18] sm:$0xf]  ;;  %v1488_v24 = vld [vmem:[#allocation7 + $0x1c] sm:$0xf] }
  0x35   :  { %794 = vmatpush.bf16.msrb.mxu0 %v1520_v25  ;;  %v1541_v12 = vld [vmem:[#allocation10 + $0x180] sm:$0xff]  ;;  %v1492_v18 = vld [vmem:[#allocation7 + $0x34] sm:$0xf0]  ;;  %v1158_v25 = vld [vmem:[#allocation7 + $0x38] sm:$0xf0] }
  0x36   :  { %754 = vmatpush.bf16.msra.mxu1 %v1494_v26  ;;  %v1148_v13 = vld [vmem:[#allocation7 + $0x10] sm:$0xf]  ;;  %v1487_v15 = vld [vmem:[#allocation7 + $0x14] sm:$0xf]  ;;  %v1550_v19 = vld [vmem:[#allocation10 + $0x1c8] sm:$0xff]  ;;  %v1157_v22 = vor.u32 %v1492_v18, %v1156_v17  ;;  %v1161_v26 = vor.u32 %v1488_v24, %v1158_v25 }
  0x37   :  { %768 = vmatpush.bf16.msra.mxu2 %v1502_v27  ;;  %v1491_v14 = vld [vmem:[#allocation7 + $0x2c] sm:$0xf0]  ;;  %v1150_v16 = vld [vmem:[#allocation7 + $0x30] sm:$0xf0]  ;;  %v1564_v27 = vld [vmem:[#allocation12 + $0x38] sm:$0xff] }
  0x38   :  { %782 = vmatpush.bf16.msra.mxu3 %v1510_v28  ;;  %v1149_v20 = vor.u32 %v1491_v14, %v1148_v13  ;;  %v1153_v21 = vor.u32 %v1487_v15, %v1150_v16  ;;  %v1549_v23 = vld [vmem:[#allocation10 + $0x1c0] sm:$0xff]  ;;  %v1563_v28 = vld [vmem:[#allocation12 + $0x30] sm:$0xff]  ;;  %v1588_v25 = vld [vmem:[%s1884_s7] ss:$0 sm:$0xff]  ;;  %s1786_s7 = smov [#allocation15]  }
  0x39   :  { %795 = vmatpush.bf16.msrb.mxu0 %v1519_v29  ;;  %v1559_v35 = vld [vmem:[#allocation12 + $0x10] sm:$0xff] }
  0x3a   :  { %755 = vmatpush.bf16.msra.mxu1 %v1493_v30  ;;  %v1562_v30 = vld [vmem:[#allocation12 + $0x28] sm:$0xff] }
  0x3b   :  { %769 = vmatpush.bf16.msra.mxu2 %v1501_v31  ;;  %v1561_v31 = vld [vmem:[#allocation12 + $0x20] sm:$0xff] }
  0x3c   :  { %783 = vmatpush.bf16.msra.mxu3 %v1509_v32 }
  0x3d   :  { %796 = vmatpush.bf16.msrb.mxu0 %v1518_v33  ;;  %756 = vmatmul.bf16.vlgmr.msra.gmra.mxu1 %v1133_v46  ;;  %v1560_v33 = vld [vmem:[#allocation12 + $0x18] sm:$0xff] }
  0x3e   :  { %804 = vmatpush.bf16.msrb.mxu1 %v1532_v38  ;;  %770 = vmatmul.bf16.vlgmr.msra.gmra.mxu2 %v1137_v43  ;;  %v1558_v38 = vld [vmem:[#allocation12 + $0x8] sm:$0xff]  ;;  %v1572_v43 = vld [vmem:[#allocation13 + $0x38] sm:$0xff] }
  0x3f   :  { %818 = vmatpush.bf16.msrb.mxu2 %v1540_v41  ;;  %784 = vmatmul.bf16.vlgmr.msra.gmra.mxu3 %v1141_v44  ;;  %v1557_v41 = vld [vmem:[#allocation12] sm:$0xff] }
  0x40   :  { %832 = vmatpush.bf16.msrb.mxu3 %v1548_v42 }
  0x41   :  { %797 = vmatpush.bf16.msrb.mxu0 %v1517_v45 }
  0x42   :  { %805 = vmatpush.bf16.msrb.mxu1 %v1531_v47  ;;  %v1571_v47 = vld [vmem:[#allocation13 + $0x30] sm:$0xff] }
  0x43   :  { %819 = vmatpush.bf16.msrb.mxu2 %v1539_v50 }
  0x44   :  { %833 = vmatpush.bf16.msrb.mxu3 %v1547_v51  ;;  %798 = vmatmul.bf16.vlgmr.msrb.gmra.mxu0 %v1145_v53 }
  0x45   :  { %846 = vmatpush.bf16.msra.mxu0 %v1556_v52  ;;  %v1570_v52 = vld [vmem:[#allocation13 + $0x28] sm:$0xff] }
  0x46   :  { %806 = vmatpush.bf16.msrb.mxu1 %v1530_v54 }
  0x47   :  { %820 = vmatpush.bf16.msrb.mxu2 %v1538_v55 }
  0x48   :  { %834 = vmatpush.bf16.msrb.mxu3 %v1546_v56 }
  0x49   :  { %847 = vmatpush.bf16.msra.mxu0 %v1555_v57 }
  0x4a   :  { %807 = vmatpush.bf16.msrb.mxu1 %v1529_v58  ;;  %v1569_v58 = vld [vmem:[#allocation13 + $0x20] sm:$0xff] }
  0x4b   :  { %821 = vmatpush.bf16.msrb.mxu2 %v1537_v59 }
  0x4c   :  { %835 = vmatpush.bf16.msrb.mxu3 %v1545_v60 }
  0x4d   :  { %848 = vmatpush.bf16.msra.mxu0 %v1554_v61 }
  0x4e   :  { %808 = vmatpush.bf16.msrb.mxu1 %v1528_v62 }
  0x4f   :  { %822 = vmatpush.bf16.msrb.mxu2 %v1536_v63 }
  0x50   :  { %836 = vmatpush.bf16.msrb.mxu3 %v1544_v0  ;;  %v1587_v0 = vld [vmem:[%s1882_s5] ss:$0 sm:$0xff] }
  0x51   :  { %849 = vmatpush.bf16.msra.mxu0 %v1553_v1 }
  0x52   :  { %809 = vmatpush.bf16.msrb.mxu1 %v1527_v2 }
  0x53   :  { %823 = vmatpush.bf16.msrb.mxu2 %v1535_v3  ;;  %v1586_v3 = vld [vmem:[%s1880_s3] ss:$0 sm:$0xff] }
  0x54   :  { %837 = vmatpush.bf16.msrb.mxu3 %v1543_v4 }
  0x55   :  { %850 = vmatpush.bf16.msra.mxu0 %v1552_v5 }
  0x56   :  { %810 = vmatpush.bf16.msrb.mxu1 %v1526_v6 }
  0x57   :  { %824 = vmatpush.bf16.msrb.mxu2 %v1534_v7 }
  0x58   :  { %838 = vmatpush.bf16.msrb.mxu3 %v1542_v8 }
  0x59   :  { %851 = vmatpush.bf16.msra.mxu0 %v1551_v9 }
  0x5a   :  { %811 = vmatpush.bf16.msrb.mxu1 %v1525_v10 }
  0x5b   :  { %825 = vmatpush.bf16.msrb.mxu2 %v1533_v11 }
  0x5c   :  { %839 = vmatpush.bf16.msrb.mxu3 %v1541_v12 }
  0x5d   :  { %852 = vmatpush.bf16.msra.mxu0 %v1550_v19  ;;  %812 = vmatmul.bf16.vlgmr.msrb.gmra.mxu1 %v1149_v20  ;;  %v1568_v20 = vld [vmem:[#allocation13 + $0x18] sm:$0xff] }
  0x5e   :  { %826 = vmatmul.bf16.vlgmr.msrb.gmra.mxu2 %v1153_v21  ;;  %950 = vmatpush.bf16.msra.mxu1 %v1564_v27  ;;  %v1567_v21 = vld [vmem:[#allocation13 + $0x10] sm:$0xff] }
  0x5f   :  { %840 = vmatmul.bf16.vlgmr.msrb.gmra.mxu3 %v1157_v22  ;;  %1035 = vmatpush.bf16.msra.mxu2 %v1572_v43  ;;  %v1566_v22 = vld [vmem:[#allocation13 + $0x8] sm:$0xff] }
  0x61   :  { %853 = vmatpush.bf16.msra.mxu0 %v1549_v23  ;;  %v1565_v23 = vld [vmem:[#allocation13] sm:$0xff] }
  0x62   :  { %951 = vmatpush.bf16.msra.mxu1 %v1563_v28 }
  0x63   :  { %1036 = vmatpush.bf16.msra.mxu2 %v1571_v47 }
  0x64   :  { %854 = vmatmul.bf16.vlgmr.msra.gmra.mxu0 %v1161_v26 }
  0x66   :  { %952 = vmatpush.bf16.msra.mxu1 %v1562_v30 }
  0x67   :  { %1037 = vmatpush.bf16.msra.mxu2 %v1570_v52 }
  0x6a   :  { %953 = vmatpush.bf16.msra.mxu1 %v1561_v31 }
  0x6b   :  { %1038 = vmatpush.bf16.msra.mxu2 %v1569_v58 }
  0x6e   :  { %954 = vmatpush.bf16.msra.mxu1 %v1560_v33 }
  0x6f   :  { %1039 = vmatpush.bf16.msra.mxu2 %v1568_v20 }
  0x72   :  { %955 = vmatpush.bf16.msra.mxu1 %v1559_v35 }
  0x73   :  { %1040 = vmatpush.bf16.msra.mxu2 %v1567_v21 }
  0x76   :  { %956 = vmatpush.bf16.msra.mxu1 %v1558_v38 }
  0x77   :  { %1041 = vmatpush.bf16.msra.mxu2 %v1566_v22 }
  0x7a   :  { %957 = vmatpush.bf16.msra.mxu1 %v1557_v41 }
  0x7b   :  { %1042 = vmatpush.bf16.msra.mxu2 %v1565_v23 }
  0xa1   :  { %v177_v29 = vpop.f32.mrf.mxu0 }
  0xa2   :  { %v178_v9 = vadd.f32 %v1586_v3, %v177_v29 }
  0xa4   :  { %v182_v14 = vmax.f32 %v178_v9, 0.0 }
  0xa9   :  { %v179_v32 = vpop.f32.mrf.mxu0 }
  0xaa   :  { %v180_v10 = vadd.f32 %v1586_v3, %v179_v32  ;;  %v1589_v32 = vld [vmem:[%s1886_s9] ss:$0 sm:$0xff]  ;;  %s1099_s9 = sshll.u32 %s1786_s7, 4  ;;  %s1100_s9 = int_to_ptr.vmem [resolvable:$true] %s1099_s9 }
  0xac   :  { %v183_v15 = vmax.f32 %v180_v10, 0.0 }
  0xba   :  { %v757_v34 = vpop.f32.mrf.mxu1 }
  0xc1   :  { %v771_v36 = vpop.f32.mrf.mxu2  ;;  %v799_v39 = vpop.f32.mrf.mxu0 }
  0xc2   :  { %v785_v37 = vpop.f32.mrf.mxu3  ;;  %v759_v40 = vpop.f32.mrf.mxu1  ;;  %v772_v42 = vadd.f32 %v771_v36, %v757_v34 }
  0xc4   :  { %v786_v46 = vadd.f32 %v785_v37, %v772_v42 }
  0xc6   :  { %v800_v50 = vadd.f32 %v799_v39, %v786_v46 }
  0xc9   :  { %v773_v44 = vpop.f32.mrf.mxu2  ;;  %v801_v48 = vpop.f32.mrf.mxu0 }
  0xca   :  { %v787_v45 = vpop.f32.mrf.mxu3  ;;  %v774_v51 = vadd.f32 %v773_v44, %v759_v40 }
  0xcc   :  { %v788_v56 = vadd.f32 %v787_v45, %v774_v51 }
  0xce   :  { %v802_v62 = vadd.f32 %v801_v48, %v788_v56 }
  0xda   :  { %v813_v49 = vpop.f32.mrf.mxu1 }
  0xdb   :  { %v814_v53 = vadd.f32 %v813_v49, %v800_v50 }
  0xe1   :  { %v827_v54 = vpop.f32.mrf.mxu2  ;;  %v855_v59 = vpop.f32.mrf.mxu0 }
  0xe2   :  { %v841_v55 = vpop.f32.mrf.mxu3  ;;  %v828_v57 = vadd.f32 %v827_v54, %v814_v53  ;;  %v815_v61 = vpop.f32.mrf.mxu1 }
  0xe3   :  { %v816_v1 = vadd.f32 %v815_v61, %v802_v62 }
  0xe4   :  { %v842_v60 = vadd.f32 %v841_v55, %v828_v57 }
  0xe6   :  { %v856_v63 = vadd.f32 %v855_v59, %v842_v60 }
  0xe8   :  { %v873_v6 = vadd.f32 %v1587_v0, %v856_v63 }
  0xe9   :  { %v829_v2 = vpop.f32.mrf.mxu2  ;;  %v857_v8 = vpop.f32.mrf.mxu0 }
  0xea   :  { %v830_v4 = vadd.f32 %v829_v2, %v816_v1  ;;  %v843_v5 = vpop.f32.mrf.mxu3  ;;  %v875_v12 = vmax.f32 %v873_v6, 0.0 }
  0xec   :  { %v844_v7 = vadd.f32 %v843_v5, %v830_v4  ;;  %v879_v17 = vmul.f32 %v875_v12, %v182_v14 }
  0xee   :  { %v858_v11 = vadd.f32 %v857_v8, %v844_v7 }
  0xf0   :  { %v874_v13 = vadd.f32 %v1587_v0, %v858_v11 }
  0xf2   :  { %v876_v16 = vmax.f32 %v874_v13, 0.0 }
  0xf4   :  { %v880_v18 = vmul.f32 %v876_v16, %v183_v15 }
  0xf6   :  { %v881_v19 = vpack.c.bf16 %v880_v18, %v879_v17 }
  0xf8   :  { %958 = vmatmul.bf16.vlgmr.msra.gmra.mxu1 %v881_v19 }
 0x175   :  { %v959_v24 = vpop.f32.mrf.mxu1 }
 0x176   :  { %v960_v26 = vadd.f32 %v1588_v25, %v959_v24 }
 0x178   :  { %v964_v29 = vmax.f32 %v960_v26, 0.0 }
 0x17d   :  { %v961_v27 = vpop.f32.mrf.mxu1 }
 0x17e   :  { %v962_v28 = vadd.f32 %v1588_v25, %v961_v27 }
 0x180   :  { %v965_v30 = vmax.f32 %v962_v28, 0.0 }
 0x182   :  { %v966_v31 = vpack.c.bf16 %v965_v30, %v964_v29 }
 0x184   :  { %1043 = vmatmul.bf16.vlgmr.msra.gmra.mxu2 %v966_v31 }
 0x207   :  { %v1044_v33 = vpop.f32.mrf.mxu2 }
 0x208   :  { %v1045_v34 = vadd.f32 %v1589_v32, %v1044_v33 }
 0x20a   :  { %1049 = vmax.xlane.f32.xlu0 %v1045_v34 }
 0x20f   :  { %v1046_v35 = vpop.f32.mrf.mxu2 }
 0x210   :  { %v1047_v36 = vadd.f32 %v1589_v32, %v1046_v35 }
 0x212   :  { %1051 = vmax.xlane.f32.xlu0 %v1047_v36 }
 0x27d   :  { %v1050_v37 = vpop.xlane.xlu0 %1049 }
 0x27e   :  { %v1053_v38 = vsub.f32 %v1045_v34, %v1050_v37 }
 0x280   :  { %v1055_v39 = vmul.f32 1.442695, %v1053_v38 }
 0x282   :  { %1590 = vpow2.f32 %v1055_v39 }
 0x285   :  { %v1052_v40 = vpop.xlane.xlu0 %1051 }
 0x286   :  { %v1054_v41 = vsub.f32 %v1047_v36, %v1052_v40 }
 0x288   :  { %v1591_v42 = vpop.eup %1590  ;;  %v1057_v43 = vmul.f32 1.442695, %v1054_v41 }
 0x289   :  { %1059 = vadd.xlane.f32.xlu1 %v1591_v42 }
 0x28a   :  { %1592 = vpow2.f32 %v1057_v43 }
 0x290   :  { %v1593_v44 = vpop.eup %1592 }
 0x291   :  { %1061 = vadd.xlane.f32.xlu1 %v1593_v44 }
 0x2fc   :  { %v1060_v45 = vpop.xlane.xlu1 %1059 }
 0x2fd   :  { %1594 = vrcp.f32 %v1060_v45  ;;  %v1074_v50 = vand.u32 2147483648, %v1060_v45  ;;  %v1072_v52 = vand.u32 2147483647, %v1060_v45  ;;  %vm1068_vm2 = vweird.f32 %v1060_v45 }
 0x2ff   :  { %v1075_v55 = vor.u32 1.1754944e-38, %v1074_v50  ;;  %vm1073_vm4 = vcmp.eq.f32.partialorder %v1072_v52, 8.507059e+37 }
 0x303   :  { %v1595_v46 = vpop.eup %1594 }
 0x304   :  { %v1064_v47 = vmul.f32 %v1595_v46, %v1060_v45  ;;  %v1062_v48 = vpop.xlane.xlu1 %1061  ;;  %vm1069_vm1 = vweird.f32 %v1595_v46 }
 0x305   :  { %1596 = vrcp.f32 %v1062_v48  ;;  %vm1070_vm3 = vmor %vm1068_vm2, %vm1069_vm1  ;;  %v1089_v61 = vand.u32 2147483648, %v1062_v48  ;;  %v1087_v63 = vand.u32 2147483647, %v1062_v48  ;;  %vm1083_vm6 = vweird.f32 %v1062_v48 }
 0x306   :  { %v1065_v49 = vsub.f32 1.0, %v1064_v47 }
 0x307   :  { %v1090_v1 = vor.u32 1.1754944e-38, %v1089_v61  ;;  %vm1088_vm8 = vcmp.eq.f32.partialorder %v1087_v63, 8.507059e+37 }
 0x308   :  { %v1066_v51 = vmul.f32 %v1595_v46, %v1065_v49 }
 0x30a   :  { %v1067_v53 = vadd.f32 %v1595_v46, %v1066_v51 }
 0x30b   :  { %v1597_v54 = vpop.eup %1596 }
 0x30c   :  { %v1071_v56 = vsel %vm1070_vm3, %v1595_v46, %v1067_v53  ;;  %v1079_v57 = vmul.f32 %v1597_v54, %v1062_v48  ;;  %vm1084_vm5 = vweird.f32 %v1597_v54 }
 0x30d   :  { %v1076_v58 = vsel %vm1073_vm4, %v1075_v55, %v1071_v56  ;;  %vm1085_vm7 = vmor %vm1083_vm6, %vm1084_vm5 }
 0x30e   :  { %v1077_v59 = vmul.f32 %v1591_v42, %v1076_v58  ;;  %v1080_v60 = vsub.f32 1.0, %v1079_v57 }
 0x310   :  { %1093 = vst [vmem:[#allocation15] sm:$0xff] %v1077_v59  ;;  %v1081_v62 = vmul.f32 %v1597_v54, %v1080_v60 }
 0x312   :  { %v1082_v0 = vadd.f32 %v1597_v54, %v1081_v62 }
 0x314   :  { %v1086_v2 = vsel %vm1085_vm7, %v1597_v54, %v1082_v0 }
 0x315   :  { %v1091_v3 = vsel %vm1088_vm8, %v1090_v1, %v1086_v2 }
 0x316   :  { %v1092_v4 = vmul.f32 %v1593_v44, %v1091_v3 }
 0x318   :  { %1094 = vst [vmem:[#allocation15 + $0x8] sm:$0xff] %v1092_v4 }
 0x319   :  { %1107 = dma.vmem_to_hbm [thread:$0]  %s1100_s9, 256, %s1102_s28, [#allocation6], %s1787_s29, %s1787_s29, %s1788_s30  }
 0x31a   :  { %1774 = dma.done.wait [#allocation6], 256  }
 0x31b   :  { %1775 = vsyncadd [#allocation6], 4294967040 }
 0x31c   :  { %1112 = vsyncpa [#allocation5], 1 }
 0x31d   :  { %1113 = vsyncpa [#allocation8], 1 }
 0x31e   :  { %1114 = vsyncpa [#allocation11], 1 }
 0x31f   :  { %1115 = vsyncpa [#allocation14], 1 }
 0x320   :  { %1116 = vsyncpa [#allocation6], 1 }

</bundles_post_ra>
